<compile_context>
chip_gen: v7x
topology: tpu7x:2x2x1
jax: 0.10.0
libtpu: 0.0.40
codegen_flags: <defaults>
</compile_context>

<pallas_src>
import jax
import jax.numpy as jnp
from jax.experimental import pallas as pl
from jax.experimental.pallas import tpu as pltpu


def model_kernel(x_ref, o_ref):
    # x_ref: (TB, F) VMEM tile;  o_ref: (TB, 8*F) VMEM tile
    # out[:, 0:4F]  = [x, x, x, x]       (x3 = cat/cat/view of x)
    # out[:, 4F:8F] = [relu(x)] * 4      (x4 = relu(x3))
    # Re-read from VMEM per store instead of keeping the tile live across all
    # 8 stores (store-bound kernel: vld slots are free, spills are not).
    F = x_ref.shape[1]
    for i in range(4):
        o_ref[:, i * F:(i + 1) * F] = x_ref[...]
    for i in range(4, 8):
        o_ref[:, i * F:(i + 1) * F] = jnp.maximum(x_ref[...], 0)


def _row_multiple(dtype):
    # Row-tile multiple matching sublane packing: f32 -> 8, bf16 -> 16, 8-bit -> 32.
    itemsize = jnp.dtype(dtype).itemsize
    if itemsize >= 4:
        return 8
    if itemsize == 2:
        return 16
    return 32


def _vmem_capacity_bytes():
    try:
        phys = int(pltpu.get_tpu_info().vmem_capacity_bytes)
        if phys > 0:
            return phys
    except Exception:
        pass
    return 64 * 1024 * 1024  # conservative default (v7x per-TC)


def _pick_tile_rows(B, F, dtype):
    """Pick batch-tile rows: as large as the VMEM budget allows, dtype-packed."""
    mult = _row_multiple(dtype)
    if B <= mult:
        return B  # block_shape == full array dims is always legal
    itemsize = jnp.dtype(dtype).itemsize
    phys = _vmem_capacity_bytes()
    # ~40% of physical VMEM for the double-buffered (in + out) tiles; the rest
    # stays as headroom for compiler-internal scratch.
    budget = max(2 * 1024 * 1024, int(phys * 0.40))
    # Per-row bytes, double-buffered: 2 * (F + 8F) * itemsize.
    cap = budget // (2 * 9 * max(F, 1) * itemsize)
    cap = max(mult, (cap // mult) * mult)
    # Ensure at least 2 grid steps so megacore (v7x) can split rows across TCs.
    half = -(-B // 2)
    half = -(-half // mult) * mult
    tb = min(cap, half)
    # Never larger than B rounded up to the packing multiple.
    b_up = -(-B // mult) * mult
    return max(mult, min(tb, b_up))


def model_forward(x):
    # TODO(synk): the PyTorch module's 1-D branch (len(x.shape)==1) is dead code
    # (torch.cat(dim=1) on a 1-D tensor raises in PyTorch), so only the 2-D
    # path is implemented here.
    B, F = x.shape
    tb = _pick_tile_rows(B, F, x.dtype)
    grid = (pl.cdiv(B, tb),)  # edge block is masked by Pallas
    itemsize = jnp.dtype(x.dtype).itemsize
    phys = _vmem_capacity_bytes()
    vmem_limit = min(int(phys * 0.75), 96 * 1024 * 1024)
    return pl.pallas_call(
        model_kernel,
        out_shape=jax.ShapeDtypeStruct((B, 8 * F), x.dtype),
        grid_spec=pltpu.PrefetchScalarGridSpec(
            num_scalar_prefetch=0,
            grid=grid,
            in_specs=[pl.BlockSpec((tb, F), lambda i: (i, 0))],
            out_specs=pl.BlockSpec((tb, 8 * F), lambda i: (i, 0)),
        ),
        compiler_params=pltpu.CompilerParams(
            dimension_semantics=("parallel",),
            vmem_limit_bytes=vmem_limit,
        ),
        cost_estimate=pl.CostEstimate(
            flops=4 * B * F,            # 4 ReLU-max passes over the tile
            transcendentals=0,
            bytes_accessed=9 * B * F * itemsize,  # read B*F, write 8*B*F
        ),
    )(x)


def reference_forward(x):
    x1 = jnp.concatenate([x, x], axis=1)
    x2 = jnp.concatenate([x1, x1], axis=1)
    x3 = x2.reshape(x2.shape[0], -1)
    x4 = jax.nn.relu(x3)
    return jnp.concatenate([x3, x4], axis=1)


if __name__ == "__main__":
    key = jax.random.PRNGKey(0)
    # Matches the module's example input: x = torch.randn(2, 3)
    x = jax.random.normal(key, (2, 3), dtype=jnp.float32)

    out = model_forward(x)
    out = jax.block_until_ready(out)

    ref = reference_forward(x)
    assert out.shape == (2, 24), out.shape
    assert jnp.allclose(out, ref, atol=1e-6), "mismatch vs reference"
    print("KERNEL_OK")
</pallas_src>

<mosaic_0001>
module attributes {stable_mosaic.version = 11 : i64} {
  func.func @model_kernel(%arg0: i32, %arg1: memref<2x3xf32, #tpu.memory_space<vmem>>, %arg2: memref<2x24xf32, #tpu.memory_space<vmem>>) attributes {dimension_semantics = [#tpu.dimension_semantics<parallel>], iteration_bounds = array<i64: 1>, scalar_prefetch = 0 : i64, scratch_operands = 0 : i64, tpu.core_type = #tpu.core_type<tc>, window_params = [{transform_indices = @transform_0, window_bounds = array<i64: 2, 3>}, {transform_indices = @transform_1, window_bounds = array<i64: 2, 24>}]} {
    %c0 = arith.constant 0 : index
    %c0_0 = arith.constant 0 : index
    %0 = vector.load %arg1[%c0, %c0_0] : memref<2x3xf32, #tpu.memory_space<vmem>>, vector<2x3xf32>
    %c0_1 = arith.constant 0 : index
    %c0_2 = arith.constant 0 : index
    %1 = vector.load %arg2[%c0_1, %c0_2] : memref<2x24xf32, #tpu.memory_space<vmem>>, vector<2x3xf32>
    tpu.vector_store %arg2[%c0_1, %c0_2], %0 {strides = array<i32>} : memref<2x24xf32, #tpu.memory_space<vmem>>, vector<2x3xf32>,
    %c0_3 = arith.constant 0 : index
    %c0_4 = arith.constant 0 : index
    %2 = vector.load %arg1[%c0_3, %c0_4] : memref<2x3xf32, #tpu.memory_space<vmem>>, vector<2x3xf32>
    %c0_5 = arith.constant 0 : index
    %c3 = arith.constant 3 : index
    %3 = vector.load %arg2[%c0_5, %c3] : memref<2x24xf32, #tpu.memory_space<vmem>>, vector<2x3xf32>
    tpu.vector_store %arg2[%c0_5, %c3], %2 {strides = array<i32>} : memref<2x24xf32, #tpu.memory_space<vmem>>, vector<2x3xf32>,
    %c0_6 = arith.constant 0 : index
    %c0_7 = arith.constant 0 : index
    %4 = vector.load %arg1[%c0_6, %c0_7] : memref<2x3xf32, #tpu.memory_space<vmem>>, vector<2x3xf32>
    %c0_8 = arith.constant 0 : index
    %c6 = arith.constant 6 : index
    %5 = vector.load %arg2[%c0_8, %c6] : memref<2x24xf32, #tpu.memory_space<vmem>>, vector<2x3xf32>
    tpu.vector_store %arg2[%c0_8, %c6], %4 {strides = array<i32>} : memref<2x24xf32, #tpu.memory_space<vmem>>, vector<2x3xf32>,
    %c0_9 = arith.constant 0 : index
    %c0_10 = arith.constant 0 : index
    %6 = vector.load %arg1[%c0_9, %c0_10] : memref<2x3xf32, #tpu.memory_space<vmem>>, vector<2x3xf32>
    %c0_11 = arith.constant 0 : index
    %c9 = arith.constant 9 : index
    %7 = vector.load %arg2[%c0_11, %c9] : memref<2x24xf32, #tpu.memory_space<vmem>>, vector<2x3xf32>
    tpu.vector_store %arg2[%c0_11, %c9], %6 {strides = array<i32>} : memref<2x24xf32, #tpu.memory_space<vmem>>, vector<2x3xf32>,
    %c0_12 = arith.constant 0 : index
    %c0_13 = arith.constant 0 : index
    %8 = vector.load %arg1[%c0_12, %c0_13] : memref<2x3xf32, #tpu.memory_space<vmem>>, vector<2x3xf32>
    %cst = arith.constant 0.000000e+00 : f32
    %9 = vector.broadcast %cst : f32 to vector<2x3xf32>
    %10 = arith.maximumf %8, %9 : vector<2x3xf32>
    %c0_14 = arith.constant 0 : index
    %c12 = arith.constant 12 : index
    %11 = vector.load %arg2[%c0_14, %c12] : memref<2x24xf32, #tpu.memory_space<vmem>>, vector<2x3xf32>
    tpu.vector_store %arg2[%c0_14, %c12], %10 {strides = array<i32>} : memref<2x24xf32, #tpu.memory_space<vmem>>, vector<2x3xf32>,
    %c0_15 = arith.constant 0 : index
    %c0_16 = arith.constant 0 : index
    %12 = vector.load %arg1[%c0_15, %c0_16] : memref<2x3xf32, #tpu.memory_space<vmem>>, vector<2x3xf32>
    %cst_17 = arith.constant 0.000000e+00 : f32
    %13 = vector.broadcast %cst_17 : f32 to vector<2x3xf32>
    %14 = arith.maximumf %12, %13 : vector<2x3xf32>
    %c0_18 = arith.constant 0 : index
    %c15 = arith.constant 15 : index
    %15 = vector.load %arg2[%c0_18, %c15] : memref<2x24xf32, #tpu.memory_space<vmem>>, vector<2x3xf32>
    tpu.vector_store %arg2[%c0_18, %c15], %14 {strides = array<i32>} : memref<2x24xf32, #tpu.memory_space<vmem>>, vector<2x3xf32>,
    %c0_19 = arith.constant 0 : index
    %c0_20 = arith.constant 0 : index
    %16 = vector.load %arg1[%c0_19, %c0_20] : memref<2x3xf32, #tpu.memory_space<vmem>>, vector<2x3xf32>
    %cst_21 = arith.constant 0.000000e+00 : f32
    %17 = vector.broadcast %cst_21 : f32 to vector<2x3xf32>
    %18 = arith.maximumf %16, %17 : vector<2x3xf32>
    %c0_22 = arith.constant 0 : index
    %c18 = arith.constant 18 : index
    %19 = vector.load %arg2[%c0_22, %c18] : memref<2x24xf32, #tpu.memory_space<vmem>>, vector<2x3xf32>
    tpu.vector_store %arg2[%c0_22, %c18], %18 {strides = array<i32>} : memref<2x24xf32, #tpu.memory_space<vmem>>, vector<2x3xf32>,
    %c0_23 = arith.constant 0 : index
    %c0_24 = arith.constant 0 : index
    %20 = vector.load %arg1[%c0_23, %c0_24] : memref<2x3xf32, #tpu.memory_space<vmem>>, vector<2x3xf32>
    %cst_25 = arith.constant 0.000000e+00 : f32
    %21 = vector.broadcast %cst_25 : f32 to vector<2x3xf32>
    %22 = arith.maximumf %20, %21 : vector<2x3xf32>
    %c0_26 = arith.constant 0 : index
    %c21 = arith.constant 21 : index
    %23 = vector.load %arg2[%c0_26, %c21] : memref<2x24xf32, #tpu.memory_space<vmem>>, vector<2x3xf32>
    tpu.vector_store %arg2[%c0_26, %c21], %22 {strides = array<i32>} : memref<2x24xf32, #tpu.memory_space<vmem>>, vector<2x3xf32>,
    return
  }
  func.func @transform_0(%arg0: i32) -> (i32, i32) {
    %c0_i32 = arith.constant 0 : i32
    %c0_i32_0 = arith.constant 0 : i32
    return %arg0, %c0_i32 : i32, i32
  }
  func.func @transform_1(%arg0: i32) -> (i32, i32) {
    %c0_i32 = arith.constant 0 : i32
    %c0_i32_0 = arith.constant 0 : i32
    return %arg0, %c0_i32 : i32, i32
  }
}

</mosaic_0001>

<bundles_post_ra>
// kernel: tpu_custom_call.1
= control target key start
LH: loop header
LB: loop body
LE: loop exit
PB: predicated region body
PF: predicated region fallthrough
CT: control target
= control target key end

     0   :  { %6 = vsyncpa [#allocation3], 0  ;;  %s192_s0 = inlined_call_operand.hbm [shape: f32[2,3], index: 0, kind: input, shape index: {}]   ;;  %s193_s1 = inlined_call_operand.hbm [shape: f32[2,24], index: 1, kind: output, shape index: {}]  }
   0x1   :  { %7 = vsyncpa [#allocation4], 0  ;;  %s149_s6 = smov [#allocation2]   ;;  %s101_s10 = scalar_lea.hbm %s192_s0, 32 }
   0x2   :  { %s14_s7 = sshll.u32 %s149_s6, 4  ;;  %p102_p0 = scmp.ne.s32.totalorder %s192_s0, %s101_s10  ;;  %s15_s7 = int_to_ptr.vmem [resolvable:$true] %s14_s7 }
   0x3   :  { %p105_p1 = scmp.lt.u32.totalorder %s101_s10, %s192_s0 }
   0x5   :  { %p107_p2 = pnand %p105_p1, %p102_p0 }
   0x7   :  { %110 = shalt.err (!%p107_p2)
}
   0x8   :  { %s111_s15 = scalar_lea.vmem %s15_s7, 32  ;;  %p116_p4 = scmp.lt.s32.totalorder %s15_s7, %s15_s7 }
   0x9   :  { %p112_p3 = scmp.ne.s32.totalorder %s15_s7, %s111_s15  ;;  %p117_p5 = scmp.lt.s32.totalorder %s111_s15, %s111_s15 }
   0xb   :  { %p118_p6 = por %p117_p5, %p116_p4 }
   0xd   :  { %p119_p7 = pnand %p118_p6, %p112_p3 }
   0xf   :  { %122 = shalt.err (!%p119_p7)
}
  0x10   :  { %17 = dma.hbm_to_vmem [thread:$0]  %s192_s0, 32, %s15_s7, [#allocation3]  }
  0x11   :  { %145 = dma.done.wait [#allocation3], 32  }
  0x12   :  { %146 = vsyncadd [#allocation3], 4294967264  ;;  %v24_v0 = vld [vmem:[#allocation2] sm:$0x3]  ;;  %s150_s18 = smov 3   ;;  %s151_s19 = smov 9  }
  0x13   :  { %v38_v1 = vld [vmem:[#allocation2] sm:$0x3]  ;;  %26 = vrot.lane.b32.xlu0 %v24_v0, %s150_s18  ;;  %vm22_vm0 = vcmask 17408   ;;  %s152_s20 = smov 6   ;;  %s153_s21 = smov 12   ;;  %vm29_vm1 = vcmask 42008  }
  0x14   :  { %40 = vrot.lane.b32.xlu1 %v38_v1, %s151_s19  ;;  %v31_v2 = vld [vmem:[#allocation2] sm:$0x3]  ;;  %s154_s0 = smov 15   ;;  %s155_s22 = smov 18   ;;  %vm36_vm2 = vcmask 66608   ;;  %vm43_vm3 = vcmask 91208  }
  0x15   :  { %v45_v3 = vld [vmem:[#allocation2] sm:$0x3]  ;;  %s156_s23 = smov 21   ;;  %vm51_vm4 = vcmask 115808   ;;  %vm59_vm5 = vcmask 140408   ;;  %vm67_vm6 = vcmask 165008  }
  0x16   :  { %v46_v4 = vmax.f32 %v45_v3, 0.0  ;;  %v53_v5 = vld [vmem:[#allocation2] sm:$0x3]  ;;  %s157_s24 = smov [#allocation5]   ;;  %vm75_vm7 = vcmask 189608  }
  0x17   :  { %v61_v6 = vld [vmem:[#allocation2] sm:$0x3]  ;;  %33 = vrot.lane.b32.xlu0 %v31_v2, %s152_s20  ;;  %v54_v8 = vmax.f32 %v53_v5, 0.0  ;;  %s83_s25 = sshll.u32 %s157_s24, 4  ;;  %s84_s25 = int_to_ptr.vmem [resolvable:$true] %s83_s25 }
  0x18   :  { %v21_v7 = vld [vmem:[#allocation2] sm:$0x3]  ;;  %48 = vrot.lane.b32.xlu1 %v46_v4, %s153_s21  ;;  %v62_v9 = vmax.f32 %v61_v6, 0.0  ;;  %s123_s26 = scalar_lea.vmem %s84_s25, 32  ;;  %p128_p9 = scmp.lt.s32.totalorder %s84_s25, %s84_s25 }
  0x19   :  { %23 = vst.msk [vmem:[#allocation5] sm:$0x3] %vm22_vm0, %v21_v7  ;;  %v69_v10 = vld [vmem:[#allocation2] sm:$0x3]  ;;  %p124_p8 = scmp.ne.s32.totalorder %s84_s25, %s123_s26  ;;  %p129_p10 = scmp.lt.s32.totalorder %s123_s26, %s123_s26 }
  0x1a   :  { %v70_v11 = vmax.f32 %v69_v10, 0.0 }
  0x1b   :  { %56 = vrot.lane.b32.xlu0 %v54_v8, %s154_s0  ;;  %p130_p11 = por %p129_p10, %p128_p9 }
  0x1c   :  { %64 = vrot.lane.b32.xlu1 %v62_v9, %s155_s22 }
  0x1d   :  { %p131_p12 = pnand %p130_p11, %p124_p8 }
  0x1f   :  { %72 = vrot.lane.b32.xlu0 %v70_v11, %s156_s23 }
  0x85   :  { %v27_v12 = vpop.permute.xlu0 %26 }
  0x86   :  { %v41_v13 = vpop.permute.xlu1 %40  ;;  %30 = vst.msk [vmem:[#allocation5] sm:$0x3] %vm29_vm1, %v27_v12 }
  0x89   :  { %v34_v14 = vpop.permute.xlu0 %33 }
  0x8a   :  { %v49_v15 = vpop.permute.xlu1 %48  ;;  %37 = vst.msk [vmem:[#allocation5] sm:$0x3] %vm36_vm2, %v34_v14 }
  0x8b   :  { %44 = vst.msk [vmem:[#allocation5] sm:$0x3] %vm43_vm3, %v41_v13 }
  0x8c   :  { %52 = vst.msk [vmem:[#allocation5] sm:$0x3] %vm51_vm4, %v49_v15 }
  0x8d   :  { %v57_v16 = vpop.permute.xlu0 %56 }
  0x8e   :  { %v65_v17 = vpop.permute.xlu1 %64  ;;  %60 = vst.msk [vmem:[#allocation5] sm:$0x3] %vm59_vm5, %v57_v16 }
  0x8f   :  { %68 = vst.msk [vmem:[#allocation5] sm:$0x3] %vm67_vm6, %v65_v17 }
  0x91   :  { %v73_v18 = vpop.permute.xlu0 %72 }
  0x92   :  { %76 = vst.msk [vmem:[#allocation5] sm:$0x3] %vm75_vm7, %v73_v18 }
  0x93   :  { %134 = shalt.err (!%p131_p12)
}
  0x94   :  { %s135_s29 = scalar_lea.hbm %s193_s1, 32 }
  0x95   :  { %p136_p13 = scmp.ne.s32.totalorder %s193_s1, %s135_s29  ;;  %p139_p0 = scmp.lt.u32.totalorder %s135_s29, %s193_s1 }
  0x97   :  { %p141_p1 = pnand %p139_p0, %p136_p13 }
  0x99   :  { %144 = shalt.err (!%p141_p1)
}
  0x9a   :  { %86 = dma.vmem_to_hbm [thread:$0]  %s84_s25, 32, %s193_s1, [#allocation4]  }
  0x9b   :  { %147 = dma.done.wait [#allocation4], 32  }
  0x9c   :  { %148 = vsyncadd [#allocation4], 4294967264 }
  0x9d   :  { %90 = vsyncpa [#allocation3], 1 }
  0x9e   :  { %91 = vsyncpa [#allocation4], 1 }

</bundles_post_ra>
